<compile_context>
chip_gen: v6e
topology: v6e:2x2x1
jax: 0.10.0
libtpu: 0.0.40
codegen_flags: <defaults>
</compile_context>

<pallas_src>
import jax
import jax.numpy as jnp
from jax.experimental import pallas as pl
from jax.experimental.pallas import tpu as pltpu


def _linear_sigmoid_kernel(x_ref, w_ref, b_ref, o_ref):
    # x_ref: (tile_m, K) VMEM   w_ref: (K, P) VMEM
    # b_ref: (1,) SMEM          o_ref: (tile_m, P) VMEM
    z = jnp.dot(x_ref[...], w_ref[...],
                preferred_element_type=jnp.float32)        # MXU mat-vec
    z = z + b_ref[0]                                       # scalar bias from SMEM
    o_ref[...] = jax.nn.sigmoid(z).astype(o_ref.dtype)     # EUP


def _round_up(v, m):
    return ((v + m - 1) // m) * m


def _matvec_sigmoid_2d(x2d, w_mat, bias, tile_m):
    """sigmoid(x2d @ w_mat + bias) with a batch-tiled Pallas pipeline."""
    M, K = x2d.shape
    P = w_mat.shape[1]

    if tile_m is None:
        # Target ~2 MiB of x per grid step (VMEM rows are lane-padded to 128).
        target_bytes = 2 * 1024 * 1024
        bytes_per_row = 4 * _round_up(K, 128)
        tile_m = max(8, (target_bytes // bytes_per_row) // 8 * 8)

    if M <= 8:
        tile_m = M                                   # single block == full array
    else:
        tile_m = min(_round_up(tile_m, 8), _round_up(M, 8))

    grid = pl.cdiv(M, tile_m)                        # ragged last block, no pad

    return pl.pallas_call(
        _linear_sigmoid_kernel,
        out_shape=jax.ShapeDtypeStruct((M, P), x2d.dtype),
        grid_spec=pltpu.PrefetchScalarGridSpec(
            num_scalar_prefetch=0,
            grid=(grid,),
            in_specs=[
                pl.BlockSpec((tile_m, K), lambda i: (i, 0)),   # x rows, pipelined
                pl.BlockSpec((K, P), lambda i: (0, 0)),        # weight, resident
                pl.BlockSpec(memory_space=pltpu.SMEM),         # bias scalar
            ],
            out_specs=pl.BlockSpec((tile_m, P), lambda i: (i, 0)),
        ),
        compiler_params=pltpu.CompilerParams(
            dimension_semantics=("parallel",),        # independent batch tiles
            vmem_limit_bytes=32 * 1024 * 1024,        # safe on v5e/v6e/v7x
        ),
    )(x2d, w_mat, bias)


def linear_sigmoid(x, weight, bias, *, tile_m=None):
    """Pallas equivalent of torch.sigmoid(nn.Linear(F, 1)(x)).

    x:      (N, F) float32
    weight: (1, F) float32  (PyTorch nn.Linear layout)
    bias:   (1,)   float32
    returns (N, 1) float32
    """
    N, F = x.shape
    pack = 128 // F if (F <= 128 and 128 % F == 0) else 1

    if pack > 1 and N % pack == 0:
        # Lane-packed path: pack `pack` rows into one 128-lane row and reduce
        # each F-lane segment with a (128, pack) block-diagonal weight on the MXU.
        M = N // pack
        x2d = x.reshape(M, pack * F)                               # free bitcast
        w_col = weight.reshape(F, 1).astype(x.dtype)
        w_mat = jnp.kron(jnp.eye(pack, dtype=x.dtype), w_col)      # (128, pack)
        out = _matvec_sigmoid_2d(x2d, w_mat, bias, tile_m)         # (M, pack)
        return out.reshape(N, 1)                                   # row-major order

    # Generic path: plain (N, F) @ (F, 1) on the MXU.
    w_mat = weight.reshape(F, 1).astype(x.dtype)
    return _matvec_sigmoid_2d(x, w_mat, bias, tile_m)


if __name__ == "__main__":
    key = jax.random.PRNGKey(0)
    kx, kw, kb = jax.random.split(key, 3)

    N, F = 8, 32                              # batch=8, n_input_features=32
    x = jax.random.normal(kx, (N, F), dtype=jnp.float32)

    # Parameters mimicking nn.Linear(F, 1) init (uniform in [-1/sqrt(F), 1/sqrt(F)]).
    bound = 1.0 / jnp.sqrt(jnp.float32(F))
    weight = jax.random.uniform(kw, (1, F), jnp.float32, -bound, bound)
    bias = jax.random.uniform(kb, (1,), jnp.float32, -bound, bound)

    def ref(xv, wv, bv):
        return jax.nn.sigmoid(jnp.sum(xv * wv, axis=-1, keepdims=True) + bv)

    y = linear_sigmoid(x, weight, bias)
    jax.block_until_ready(y)
    assert y.shape == (N, 1)
    assert jnp.allclose(y, ref(x, weight, bias), atol=1e-5), "mismatch (packed)"

    # Multi-tile packed path with a ragged last block (no host-side padding).
    x2 = jax.random.normal(jax.random.PRNGKey(1), (100, F), dtype=jnp.float32)
    y2 = linear_sigmoid(x2, weight, bias, tile_m=8)
    jax.block_until_ready(y2)
    assert y2.shape == (100, 1)
    assert jnp.allclose(y2, ref(x2, weight, bias), atol=1e-5), "mismatch (ragged)"

    # Generic (non-packed) path: F does not divide 128.
    F3 = 48
    x3 = jax.random.normal(jax.random.PRNGKey(2), (10, F3), dtype=jnp.float32)
    w3 = jax.random.uniform(jax.random.PRNGKey(3), (1, F3), jnp.float32, -0.2, 0.2)
    b3 = jax.random.uniform(jax.random.PRNGKey(4), (1,), jnp.float32, -0.2, 0.2)
    y3 = linear_sigmoid(x3, w3, b3)
    jax.block_until_ready(y3)
    assert y3.shape == (10, 1)
    assert jnp.allclose(y3, ref(x3, w3, b3), atol=1e-5), "mismatch (generic)"

    print("KERNEL_OK")
</pallas_src>

<mosaic_0001>
module attributes {stable_mosaic.version = 11 : i64} {
  func.func @_linear_sigmoid_kernel(%arg0: i32, %arg1: memref<2x128xf32, #tpu.memory_space<vmem>>, %arg2: memref<128x4xf32, #tpu.memory_space<vmem>>, %arg3: memref<1xf32, #tpu.memory_space<smem>>, %arg4: memref<2x4xf32, #tpu.memory_space<vmem>>) attributes {dimension_semantics = [#tpu.dimension_semantics<parallel>], iteration_bounds = array<i64: 1>, scalar_prefetch = 0 : i64, scratch_operands = 0 : i64, tpu.core_type = #tpu.core_type<tc>, window_params = [{transform_indices = @transform_0, window_bounds = array<i64: 2, 128>}, {pipeline_mode = #tpu.pipeline_mode<synchronous>, transform_indices = @transform_1, window_bounds = array<i64: 128, 4>}, {transform_indices = @transform_2, window_bounds = array<i64: 1>}, {transform_indices = @transform_3, window_bounds = array<i64: 2, 4>}]} {
    %c0 = arith.constant 0 : index
    %c0_0 = arith.constant 0 : index
    %0 = vector.load %arg1[%c0, %c0_0] : memref<2x128xf32, #tpu.memory_space<vmem>>, vector<2x128xf32>
    %c0_1 = arith.constant 0 : index
    %c0_2 = arith.constant 0 : index
    %1 = vector.load %arg2[%c0_1, %c0_2] : memref<128x4xf32, #tpu.memory_space<vmem>>, vector<128x4xf32>
    %cst = arith.constant dense<0.000000e+00> : vector<2x4xf32>
    %2 = tpu.matmul %0, %1, %cst {dimension_numbers = #tpu.dot_dimension_numbers<[1], [0], [0], [1], [0, 0, 1, 1], [], []>} : vector<2x128xf32>, vector<128x4xf32>, vector<2x4xf32> -> vector<2x4xf32>
    %c0_3 = arith.constant 0 : index
    %3 = memref.load %arg3[%c0_3] : memref<1xf32, #tpu.memory_space<smem>>
    %4 = vector.broadcast %3 : f32 to vector<2x4xf32>
    %5 = arith.addf %2, %4 : vector<2x4xf32>
    %6 = arith.negf %5 : vector<2x4xf32>
    %7 = math.exp %6 : vector<2x4xf32>
    %cst_4 = arith.constant 1.000000e+00 : f32
    %8 = vector.broadcast %cst_4 : f32 to vector<2x4xf32>
    %9 = arith.addf %8, %7 : vector<2x4xf32>
    %10 = arith.divf %8, %9 : vector<2x4xf32>
    %c0_5 = arith.constant 0 : index
    %c0_6 = arith.constant 0 : index
    %11 = vector.load %arg4[%c0_5, %c0_6] : memref<2x4xf32, #tpu.memory_space<vmem>>, vector<2x4xf32>
    tpu.vector_store %arg4[%c0_5, %c0_6], %10 {strides = array<i32>} : memref<2x4xf32, #tpu.memory_space<vmem>>, vector<2x4xf32>,
    return
  }
  func.func @transform_0(%arg0: i32) -> (i32, i32) {
    %c0_i32 = arith.constant 0 : i32
    %c0_i32_0 = arith.constant 0 : i32
    return %arg0, %c0_i32 : i32, i32
  }
  func.func @transform_1(%arg0: i32) -> (i32, i32) {
    %c0_i32 = arith.constant 0 : i32
    %c0_i32_0 = arith.constant 0 : i32
    %c0_i32_1 = arith.constant 0 : i32
    return %c0_i32, %c0_i32_0 : i32, i32
  }
  func.func @transform_2(%arg0: i32) -> i32 {
    %c0_i32 = arith.constant 0 : i32
    %c0_i32_0 = arith.constant 0 : i32
    return %c0_i32 : i32
  }
  func.func @transform_3(%arg0: i32) -> (i32, i32) {
    %c0_i32 = arith.constant 0 : i32
    %c0_i32_0 = arith.constant 0 : i32
    return %arg0, %c0_i32 : i32, i32
  }
}

</mosaic_0001>

<bundles_post_ra>
// kernel: tpu_custom_call.1
= control target key start
LH: loop header
LB: loop body
LE: loop exit
PB: predicated region body
PF: predicated region fallthrough
CT: control target
= control target key end

     0   :  { %v209_v1 = vmov 0.0   ;;  %vm210_vm0 = vmmov 0   ;;  %s289_s0 = inlined_call_operand.vmem [shape: f32[2,128], index: 0, kind: input, shape index: {}]   ;;  %s290_s1 = inlined_call_operand.vmem [shape: f32[128,4], index: 1, kind: input, shape index: {}]   ;;  %s291_s2 = inlined_call_operand.<no memory space> [shape: f32[1], index: 2, kind: input, shape index: {}]   ;;  %s292_s3 = inlined_call_operand.hbm [shape: f32[2,4], index: 3, kind: output, shape index: {}]  }
   0x1   :  { %v32_v0 = vld [vmem:[%s290_s1 + $0x78] sm:$0xff]  ;;  %145 = vmatprep.subr.mxu0 %v209_v1  ;;  %v31_v2 = vld [vmem:[%s290_s1 + $0x70] sm:$0xff]  ;;  %177 = vmatprep.mubr.msk.f32.mxu0 %vm210_vm0, %v209_v1  ;;  %v30_v3 = vld [vmem:[%s290_s1 + $0x68] sm:$0xff] }
   0x2   :  { %146 = vmatpush3.msra.mxu0 %v32_v0  ;;  %v29_v4 = vld [vmem:[%s290_s1 + $0x60] sm:$0xff] }
   0x3   :  { %147 = vmatprep.subr.mxu0 %v209_v1 }
   0x4   :  { %148 = vmatpush3.msra.mxu0 %v31_v2 }
   0x5   :  { %149 = vmatprep.subr.mxu0 %v209_v1 }
   0x6   :  { %9 = vsyncpa [#allocation4], 0  ;;  %150 = vmatpush3.msra.mxu0 %v30_v3  ;;  %v28_v5 = vld [vmem:[%s290_s1 + $0x58] sm:$0xff]  ;;  %v27_v6 = vld [vmem:[%s290_s1 + $0x50] sm:$0xff]  ;;  %v34_v18 = vstv %s291_s2  ;;  %vm111_vm1 = vcmask 25600  }
   0x7   :  { %151 = vmatprep.subr.mxu0 %v209_v1  ;;  %v26_v7 = vld [vmem:[%s290_s1 + $0x48] sm:$0xff]  ;;  %v25_v8 = vld [vmem:[%s290_s1 + $0x40] sm:$0xff]  ;;  %v24_v9 = vld [vmem:[%s290_s1 + $0x38] sm:$0xff] }
   0x8   :  { %152 = vmatpush3.msra.mxu0 %v29_v4  ;;  %v23_v10 = vld [vmem:[%s290_s1 + $0x30] sm:$0xff]  ;;  %v22_v11 = vld [vmem:[%s290_s1 + $0x28] sm:$0xff]  ;;  %v21_v12 = vld [vmem:[%s290_s1 + $0x20] sm:$0xff] }
   0x9   :  { %153 = vmatprep.subr.mxu0 %v209_v1  ;;  %v20_v13 = vld [vmem:[%s290_s1 + $0x18] sm:$0xff]  ;;  %v19_v14 = vld [vmem:[%s290_s1 + $0x10] sm:$0xff]  ;;  %v18_v15 = vld [vmem:[%s290_s1 + $0x8] sm:$0xff] }
   0xa   :  { %154 = vmatpush3.msra.mxu0 %v28_v5  ;;  %v17_v16 = vld [vmem:[%s290_s1] sm:$0xff]  ;;  %s211_s1 = smov [#allocation3]  }
   0xb   :  { %155 = vmatprep.subr.mxu0 %v209_v1  ;;  %v16_v17 = vld [vmem:[%s289_s0] sm:$0x3]  ;;  %s119_s21 = sshll.u32 %s211_s1, 4  ;;  %s120_s21 = int_to_ptr.vmem [resolvable:$true] %s119_s21 }
   0xc   :  { %156 = vmatpush3.msra.mxu0 %v27_v6  ;;  %s187_s0 = scalar_lea.vmem %s120_s21, 32  ;;  %p192_p1 = scmp.lt.s32.totalorder %s120_s21, %s120_s21 }
   0xd   :  { %157 = vmatprep.subr.mxu0 %v209_v1  ;;  %p188_p0 = scmp.ne.s32.totalorder %s120_s21, %s187_s0  ;;  %p193_p2 = scmp.lt.s32.totalorder %s187_s0, %s187_s0 }
   0xe   :  { %158 = vmatpush3.msra.mxu0 %v26_v7 }
   0xf   :  { %159 = vmatprep.subr.mxu0 %v209_v1  ;;  %p194_p3 = por %p193_p2, %p192_p1 }
  0x10   :  { %160 = vmatpush3.msra.mxu0 %v25_v8 }
  0x11   :  { %161 = vmatprep.subr.mxu0 %v209_v1  ;;  %p195_p4 = pnand %p194_p3, %p188_p0 }
  0x12   :  { %162 = vmatpush3.msra.mxu0 %v24_v9 }
  0x13   :  { %163 = vmatprep.subr.mxu0 %v209_v1 }
  0x14   :  { %164 = vmatpush3.msra.mxu0 %v23_v10 }
  0x15   :  { %165 = vmatprep.subr.mxu0 %v209_v1 }
  0x16   :  { %166 = vmatpush3.msra.mxu0 %v22_v11 }
  0x17   :  { %167 = vmatprep.subr.mxu0 %v209_v1 }
  0x18   :  { %168 = vmatpush3.msra.mxu0 %v21_v12 }
  0x19   :  { %169 = vmatprep.subr.mxu0 %v209_v1 }
  0x1a   :  { %170 = vmatpush3.msra.mxu0 %v20_v13 }
  0x1b   :  { %171 = vmatprep.subr.mxu0 %v209_v1 }
  0x1c   :  { %172 = vmatpush3.msra.mxu0 %v19_v14 }
  0x1d   :  { %173 = vmatprep.subr.mxu0 %v209_v1 }
  0x1e   :  { %174 = vmatpush3.msra.mxu0 %v18_v15 }
  0x1f   :  { %175 = vmatprep.subr.mxu0 %v209_v1 }
  0x20   :  { %176 = vmatpush3.msra.mxu0 %v17_v16 }
  0x21   :  { %178 = vmatmul.mubr.f32.vlgmr.msra.gmra.mxu0 %v16_v17 }
  0xe1   :  { %v101_v19 = vpop.f32.mrf.mxu0 }
  0xe2   :  { %v102_v20 = vadd.f32 %v101_v19, %v34_v18 }
  0xe3   :  { %v179_v21 = vpop.f32.mrf.mxu0 }
  0xe4   :  { %v127_v22 = vmul.f32 -1.442695, %v102_v20 }
  0xe6   :  { %183 = vpow2.f32 %v127_v22 }
  0xf3   :  { %v184_v23 = vpop.eup %183 }
  0xf4   :  { %v108_v24 = vadd.f32 1.0, %v184_v23 }
  0xf6   :  { %185 = vrcp.f32 %v108_v24 }
 0x103   :  { %v186_v25 = vpop.eup %185 }
 0x104   :  { %112 = vst.msk [vmem:[#allocation3] sm:$0x3] %vm111_vm1, %v186_v25 }
 0x105   :  { %198 = shalt.err (!%p195_p4)
}
 0x106   :  { %122 = dma.vmem_to_hbm [thread:$0]  %s120_s21, 32, %s292_s3, [#allocation4]  }
 0x107   :  { %207 = dma.done.wait [#allocation4], 32  }
 0x108   :  { %208 = vsyncadd [#allocation4], 4294967264 }
 0x109   :  { %126 = vsyncpa [#allocation4], 1 }

</bundles_post_ra>
